<compile_context>
chip_gen: v7x
topology: tpu7x:2x2x1
jax: 0.10.0
libtpu: 0.0.40
codegen_flags: <defaults>
</compile_context>

<pallas_src>
import functools

import jax
import jax.numpy as jnp
import numpy as np
from jax.experimental import pallas as pl
from jax.experimental.pallas import tpu as pltpu

_MIB = 1 << 20


def _round_up(x, m):
    return ((x + m - 1) // m) * m


def _vmem_capacity_bytes():
    """Physical VMEM of the current generation; conservative 64 MiB fallback."""
    try:
        cap = int(getattr(pltpu.get_tpu_info(), "vmem_capacity_bytes", 0))
        if cap > 0:
            return cap
    except Exception:
        pass
    return 64 * _MIB  # v7x-sized fallback (v5e/v6e have 128 MiB)


def _pick_tile_m(n, cap, sub):
    """Balanced M tiles; >= 2 tiles whenever possible so v7x's 2 TCs both work."""
    if n <= sub:
        return n                                  # single partial tile == full dim
    grid_m = max(2, pl.cdiv(n, cap))              # at least 2 M-tiles (megacore)
    tm = _round_up(pl.cdiv(n, grid_m), sub)       # rebalance: last tile not mostly pad
    return max(sub, min(tm, _round_up(n, sub)))


def _est_vmem_whole_k(tile_m, img_dim, embed, x_isz, w_isz, o_isz):
    return (img_dim * embed * w_isz               # resident weight (single copy)
            + 2 * tile_m * img_dim * x_isz        # double-buffered x tiles
            + 2 * tile_m * embed * o_isz          # double-buffered out tiles
            + 2 * tile_m * embed * 4              # f32 epilogue temps
            + embed * 4)                          # bias


def _est_vmem_k_tiled(tile_m, block_k, embed, x_isz, w_isz, o_isz):
    return (2 * block_k * embed * w_isz           # double-buffered weight blocks
            + 2 * tile_m * block_k * x_isz        # double-buffered x blocks
            + 2 * tile_m * embed * o_isz          # double-buffered out tiles
            + tile_m * embed * 4                  # f32 accumulator
            + embed * 4)                          # bias


def _finish(y_f32, b, o_ref, *, no_imgnorm, use_abs, eps):
    """Bias add + per-row L2 normalization + optional abs, all in f32."""
    y = y_f32 + b.astype(jnp.float32)             # (tile_m, E) + (1, E)
    if not no_imgnorm:
        ss = jnp.sum(y * y, axis=1, keepdims=True)
        # rsqrt runs on the EUP (own VLIW slot); multiply replaces the divide.
        # eps defaults to 0.0 to match torch's l2norm (0/0 -> NaN there too).
        y = y * jax.lax.rsqrt(ss + eps)
    if use_abs:
        y = jnp.abs(y)
    o_ref[...] = y.astype(o_ref.dtype)


def _kernel_whole_k(x_ref, w_ref, b_ref, o_ref, *,
                    no_imgnorm, use_abs, eps, compute_dtype):
    # Single MXU matmul over the full contraction; weight/bias are whole-array
    # VMEM residents (one copy for the whole grid).  x is cast in-kernel.
    x = x_ref[...]
    if compute_dtype is not None:
        x = x.astype(compute_dtype)
    y = jnp.dot(x, w_ref[...], preferred_element_type=jnp.float32)
    _finish(y, b_ref[...], o_ref, no_imgnorm=no_imgnorm, use_abs=use_abs, eps=eps)


def _kernel_k_tiled(x_ref, w_ref, b_ref, o_ref, acc_ref, *,
                    no_imgnorm, use_abs, eps, compute_dtype):
    # K-tiled matmul with an f32 accumulator; bias + norm only in the epilogue.
    k = pl.program_id(1)

    @pl.when(k == 0)
    def _():
        acc_ref[...] = jnp.zeros_like(acc_ref)

    x = x_ref[...]
    if compute_dtype is not None:
        x = x.astype(compute_dtype)
    acc_ref[...] += jnp.dot(x, w_ref[...], preferred_element_type=jnp.float32)

    @pl.when(k == pl.num_programs(1) - 1)
    def _():
        _finish(acc_ref[...], b_ref[...], o_ref,
                no_imgnorm=no_imgnorm, use_abs=use_abs, eps=eps)


def prepare_weights(weight_t, bias, compute_dtype=jnp.bfloat16):
    """One-time cast of the fc weight for the MXU; call once and reuse."""
    if compute_dtype is not None and weight_t.dtype != compute_dtype:
        weight_t = weight_t.astype(compute_dtype)
    return weight_t, bias


def img_encoder_local(images, weight_t, bias, *, tile_m=256, block_k=None,
                      compute_dtype=jnp.bfloat16, no_imgnorm=False,
                      use_abs=False, eps=0.0, vmem_limit_bytes=None):
    """images: (N, img_dim); weight_t: (img_dim, embed) = W.T; bias: (1, embed).

    compute_dtype=jnp.bfloat16 (default): MXU runs bf16 x bf16 -> f32; the x
      tile is cast inside the kernel, the weight once (ideally via
      prepare_weights()).  compute_dtype=None keeps an exact f32 matmul.
    block_k=None: whole-K path, weight fully VMEM-resident (single copy);
      auto-switches to a K-tiled path when the resident working set does not
      fit this generation's VMEM (e.g. v7x, 64 MiB).
    block_k=int: force the K-tiled accumulator path (must divide img_dim and
      be a multiple of 128; prefer 512-1024 so accumulator traffic and
      per-step overhead do not dominate).
    """
    N, img_dim = images.shape
    embed = weight_t.shape[1]
    out_dtype = images.dtype

    # Weight cast happens at most once here (skip if caller pre-cast it);
    # the activation is cast *inside* the kernel, never in the wrapper.
    if compute_dtype is not None and weight_t.dtype != compute_dtype:
        weight_t = weight_t.astype(compute_dtype)

    x_isz = jnp.dtype(images.dtype).itemsize
    w_isz = jnp.dtype(weight_t.dtype).itemsize
    o_isz = jnp.dtype(out_dtype).itemsize

    # x stays in its HBM dtype (usually f32) -> sublane granule from that dtype.
    sub = 8 if x_isz >= 4 else (16 if x_isz == 2 else 32)
    tile_m = _pick_tile_m(N, int(tile_m), sub)
    grid_m = pl.cdiv(N, tile_m)

    cap = _vmem_capacity_bytes()
    budget = cap - 16 * _MIB          # leave room for compiler-internal scratch
    headroom = 8 * _MIB

    if block_k is None:
        est = _est_vmem_whole_k(tile_m, img_dim, embed, x_isz, w_isz, o_isz)
        if est + headroom > budget:
            # Resident weight won't fit (e.g. v7x): fall back to K-tiling with
            # the largest block_k that divides img_dim and fits the budget.
            for cand in (1024, 512, 256, 128):
                if cand < img_dim and img_dim % cand == 0:
                    est_k = _est_vmem_k_tiled(tile_m, cand, embed,
                                              x_isz, w_isz, o_isz)
                    if est_k + headroom <= budget:
                        block_k, est = cand, est_k
                        break
    else:
        if img_dim % block_k != 0 or block_k % 128 != 0:
            raise ValueError("block_k must divide img_dim and be a multiple of 128")
        est = _est_vmem_k_tiled(tile_m, block_k, embed, x_isz, w_isz, o_isz)

    if vmem_limit_bytes is None:
        need = est + headroom
        if need > 16 * _MIB:          # smallest per-generation scoped default (v5e)
            vmem_limit_bytes = int(min(need, cap - 4 * _MIB))

    cp_kwargs = {}
    if vmem_limit_bytes is not None:
        cp_kwargs["vmem_limit_bytes"] = int(vmem_limit_bytes)

    kern_kwargs = dict(no_imgnorm=no_imgnorm, use_abs=use_abs, eps=float(eps),
                       compute_dtype=compute_dtype)

    if block_k is None:
        grid_spec = pltpu.PrefetchScalarGridSpec(
            num_scalar_prefetch=0,
            grid=(grid_m,),
            in_specs=[
                pl.BlockSpec((tile_m, img_dim), lambda i: (i, 0)),
                # Constant operands: whole-array VMEM residents, single copy
                # (no per-step DMA, no double-buffering of the weight).
                pl.BlockSpec(memory_space=pltpu.MemorySpace.VMEM),
                pl.BlockSpec(memory_space=pltpu.MemorySpace.VMEM),
            ],
            out_specs=pl.BlockSpec((tile_m, embed), lambda i: (i, 0)),
        )
        kernel = functools.partial(_kernel_whole_k, **kern_kwargs)
        dims = ("parallel",)
    else:
        grid_spec = pltpu.PrefetchScalarGridSpec(
            num_scalar_prefetch=0,
            grid=(grid_m, img_dim // block_k),          # reduction axis last
            in_specs=[
                pl.BlockSpec((tile_m, block_k), lambda i, k: (i, k)),
                pl.BlockSpec((block_k, embed), lambda i, k: (k, 0)),
                pl.BlockSpec(memory_space=pltpu.MemorySpace.VMEM),
            ],
            out_specs=pl.BlockSpec((tile_m, embed), lambda i, k: (i, 0)),
            scratch_shapes=[pltpu.VMEM((tile_m, embed), jnp.float32)],
        )
        kernel = functools.partial(_kernel_k_tiled, **kern_kwargs)
        dims = ("parallel", "arbitrary")

    return pl.pallas_call(
        kernel,
        out_shape=jax.ShapeDtypeStruct((N, embed), out_dtype),
        grid_spec=grid_spec,
        compiler_params=pltpu.CompilerParams(
            dimension_semantics=dims, **cp_kwargs),
    )(images, weight_t, bias)


def init_params(key, img_dim, embed_size):
    """Xavier-uniform init for fc weight, zero bias (matches init_weights)."""
    r = np.sqrt(6.0) / np.sqrt(img_dim + embed_size)
    # PyTorch Linear weight is (embed_size, img_dim); we store its transpose.
    w = jax.random.uniform(key, (embed_size, img_dim), jnp.float32, -r, r)
    weight_t = jnp.asarray(w.T)                     # (img_dim, embed_size)
    bias = jnp.zeros((1, embed_size), jnp.float32)
    return weight_t, bias


if __name__ == "__main__":
    key = jax.random.PRNGKey(0)
    k_x, k_w = jax.random.split(key)

    # Small but MXU/lane-aligned shapes: img_dim & embed are multiples of 256
    # (full MXU passes on v6e/v7x, dense output stores).
    N, img_dim, embed_size = 32, 512, 256
    images = jax.random.normal(k_x, (N, img_dim), jnp.float32)
    weight_t_f32, bias = init_params(k_w, img_dim, embed_size)

    # pure-JAX reference (fc + per-row l2norm; defaults use_abs=False, no_imgnorm=False)
    ref = images @ weight_t_f32 + bias
    ref = ref / jnp.sqrt(jnp.sum(ref * ref, axis=1, keepdims=True))

    # Exact f32 path (compute_dtype=None) — validates matmul + epilogue tightly.
    out_f32 = jax.block_until_ready(
        img_encoder_local(images, weight_t_f32, bias, compute_dtype=None))
    np.testing.assert_allclose(np.asarray(out_f32), np.asarray(ref),
                               rtol=1e-5, atol=1e-5)

    # Default fast path: bf16 MXU operands (weight pre-cast once via
    # prepare_weights, activation cast in-kernel), f32 accumulation.
    weight_t_bf16, bias_p = prepare_weights(weight_t_f32, bias)
    out_bf16 = jax.block_until_ready(
        img_encoder_local(images, weight_t_bf16, bias_p))
    np.testing.assert_allclose(np.asarray(out_bf16), np.asarray(ref),
                               rtol=2e-2, atol=2e-2)

    # K-tiled accumulator path (small-VMEM / very large img_dim generations).
    out_kt = jax.block_until_ready(
        img_encoder_local(images, weight_t_bf16, bias_p, block_k=256))
    np.testing.assert_allclose(np.asarray(out_kt), np.asarray(ref),
                               rtol=2e-2, atol=2e-2)

    print("KERNEL_OK")
</pallas_src>

<mosaic_0001>
module attributes {stable_mosaic.version = 11 : i64} {
  func.func @_kernel_whole_k(%arg0: i32, %arg1: memref<16x512xf32, #tpu.memory_space<vmem>>, %arg2: memref<512x256xf32, #tpu.memory_space<vmem>>, %arg3: memref<1x256xf32, #tpu.memory_space<vmem>>, %arg4: memref<16x256xf32, #tpu.memory_space<vmem>>) attributes {dimension_semantics = [#tpu.dimension_semantics<parallel>], iteration_bounds = array<i64: 2>, scalar_prefetch = 0 : i64, scratch_operands = 0 : i64, tpu.core_type = #tpu.core_type<tc>, window_params = [{transform_indices = @transform_0, window_bounds = array<i64: 16, 512>}, {pipeline_mode = #tpu.pipeline_mode<synchronous>, transform_indices = @transform_1, window_bounds = array<i64: 512, 256>}, {pipeline_mode = #tpu.pipeline_mode<synchronous>, transform_indices = @transform_2, window_bounds = array<i64: 1, 256>}, {transform_indices = @transform_3, window_bounds = array<i64: 16, 256>}]} {
    %c0 = arith.constant 0 : index
    %c0_0 = arith.constant 0 : index
    %0 = vector.load %arg1[%c0, %c0_0] : memref<16x512xf32, #tpu.memory_space<vmem>>, vector<16x512xf32>
    %c0_1 = arith.constant 0 : index
    %c0_2 = arith.constant 0 : index
    %1 = vector.load %arg2[%c0_1, %c0_2] : memref<512x256xf32, #tpu.memory_space<vmem>>, vector<512x256xf32>
    %cst = arith.constant dense<0.000000e+00> : vector<16x256xf32>
    %2 = tpu.matmul %0, %1, %cst {dimension_numbers = #tpu.dot_dimension_numbers<[1], [0], [0], [1], [0, 0, 1, 1], [], []>} : vector<16x512xf32>, vector<512x256xf32>, vector<16x256xf32> -> vector<16x256xf32>
    %c0_3 = arith.constant 0 : index
    %c0_4 = arith.constant 0 : index
    %3 = vector.load %arg3[%c0_3, %c0_4] : memref<1x256xf32, #tpu.memory_space<vmem>>, vector<1x256xf32>
    %4 = vector.broadcast %3 : vector<1x256xf32> to vector<16x256xf32>
    %5 = arith.addf %2, %4 : vector<16x256xf32>
    %6 = arith.mulf %5, %5 : vector<16x256xf32>
    %cst_5 = arith.constant dense<0.000000e+00> : vector<16xf32>
    %7 = vector.multi_reduction <add>, %6, %cst_5 [1] : vector<16x256xf32> to vector<16xf32>
    %8 = vector.shape_cast %7 : vector<16xf32> to vector<16x1xf32>
    %cst_6 = arith.constant 0.000000e+00 : f32
    %9 = vector.broadcast %cst_6 : f32 to vector<16x1xf32>
    %10 = arith.addf %8, %9 : vector<16x1xf32>
    %11 = math.rsqrt %10 : vector<16x1xf32>
    %12 = vector.broadcast %11 : vector<16x1xf32> to vector<16x256xf32>
    %13 = arith.mulf %5, %12 : vector<16x256xf32>
    %c0_7 = arith.constant 0 : index
    %c0_8 = arith.constant 0 : index
    %14 = vector.load %arg4[%c0_7, %c0_8] : memref<16x256xf32, #tpu.memory_space<vmem>>, vector<16x256xf32>
    tpu.vector_store %arg4[%c0_7, %c0_8], %13 {strides = array<i32>} : memref<16x256xf32, #tpu.memory_space<vmem>>, vector<16x256xf32>,
    return
  }
  func.func @transform_0(%arg0: i32) -> (i32, i32) {
    %c0_i32 = arith.constant 0 : i32
    %c0_i32_0 = arith.constant 0 : i32
    return %arg0, %c0_i32 : i32, i32
  }
  func.func @transform_1(%arg0: i32) -> (i32, i32) {
    %c0_i32 = arith.constant 0 : i32
    %c0_i32_0 = arith.constant 0 : i32
    %c0_i32_1 = arith.constant 0 : i32
    return %c0_i32, %c0_i32_0 : i32, i32
  }
  func.func @transform_2(%arg0: i32) -> (i32, i32) {
    %c0_i32 = arith.constant 0 : i32
    %c0_i32_0 = arith.constant 0 : i32
    %c0_i32_1 = arith.constant 0 : i32
    return %c0_i32, %c0_i32_0 : i32, i32
  }
  func.func @transform_3(%arg0: i32) -> (i32, i32) {
    %c0_i32 = arith.constant 0 : i32
    %c0_i32_0 = arith.constant 0 : i32
    return %arg0, %c0_i32 : i32, i32
  }
}

</mosaic_0001>

<bundles_post_ra>
// kernel: tpu_custom_call.1
= control target key start
LH: loop header
LB: loop body
LE: loop exit
PB: predicated region body
PF: predicated region fallthrough
CT: control target
= control target key end

     0   :  { %8 = vsyncpa [#allocation3], 0  ;;  %s1228_s0 = inlined_call_operand.hbm [shape: f32[32,512], index: 0, kind: input, shape index: {}]   ;;  %s1229_s1 = inlined_call_operand.hbm [shape: f32[512,256], index: 1, kind: input, shape index: {}]   ;;  %s1230_s2 = inlined_call_operand.vmem [shape: f32[1,256], index: 2, kind: input, shape index: {}]   ;;  %s1231_s3 = inlined_call_operand.hbm [shape: f32[32,256], index: 3, kind: output, shape index: {}]  }
   0x1   :  { %10 = vsyncpa [#allocation3 + $0x1], 0 }
   0x2   :  { %11 = vsyncpa [#allocation6], 0 }
   0x3   :  { %12 = vsyncpa [#allocation4], 0 }
   0x4   :  { %14 = vsyncpa [#allocation4 + $0x1], 0  ;;  %s1013_s12 = smov 0   ;;  %s1015_s13 = smov 0  }
   0x5   :  { %s1017_s14 = smov 0   ;;  %s1019_s15 = smov 0  }
   0x6 LB: > { %s1034_s16 = sadd.s32 4294967295, %s982_s15   ;;  %s629_s17 = sadd.s32 4294967294, %s982_s15   ;;  %s982_s15 = sphi %s1019_s15, %s1251_s15   ;;  %s978_s14 = sphi %s1017_s14, %s1250_s14   ;;  %s974_s13 = sphi %s1015_s13, %s1249_s13   ;;  %s970_s12 = sphi %s1013_s12, %s1248_s12  }
   0x7   : > { %p40_p0 = scmp.ne.s32.totalorder %s974_s13, %s970_s12  ;;  %p1232_p1 = scmp.eq.s32.totalorder %s1034_s16, 0 }
   0x8   : > { %p112_p3 = scmp.eq.s32.totalorder %s629_s17, 1  ;;  %p630_p5 = scmp.ge.s32.totalorder %s982_s15, 1 }
   0x9   : > { %p1043_p4 = por %p1232_p1, %p40_p0  ;;  %p119_p7 = scmp.lt.s32.totalorder %s982_s15, 3 }
   0xa   : > { %p1048_p6 = por %p112_p3, %p40_p0  ;;  %s984_s21 = smov [#allocation5]  }
   0xb   : > { %s1235_s18 = scalar_select %p1043_p4, 1, 0 }
   0xc   : > { %s1236_s19 = scalar_select %p1048_p6, 1, 0 }
   0xd   : > { %p1053_p8 = pnand %p630_p5, %p119_p7  ;;  %s131_s22 = sshll.u32 %s984_s21, 4  ;;  %s1057_s22 = int_to_ptr.vmem [resolvable:$true] %s131_s22 }
   0xe   : > { %s1069_s24 = sadd.s32 1, %s982_s15   ;;  %s27_s25 = sadd.s32 1, %s978_s14 }
   0xf   : > { %s1237_s20 = scalar_select %p1053_p8, 1, 0 }
  0x10   : > { %p795_p9 = pneg %p1053_p8  ;;  %s24_s26 = ssub.s32 %s982_s15, %s1069_s24 }
  0x11   : > { %s854_s29 = scalar_lea.hbm %s1229_s1, 16384 }
  0x12   : > { %p1064_p11 = pnand %p795_p9, %p1232_p1  ;;  %p855_p12 = scmp.ne.s32.totalorder %s1229_s1, %s854_s29 }
  0x13   : > { %p861_p5 = scmp.lt.u32.totalorder %s854_s29, %s1229_s1 }
  0x14   : > { %p856_p13 = pneg %p1064_p11 }
  0x16   : > { %p857_p0 = pnand %p856_p13, %p855_p12 }
  0x18   : > { %p858_p3 = pneg %p857_p0 }
  0x1a   : > { %p863_p7 = pnand %p861_p5, %p858_p3 }
  0x1c   : > { %866 = shalt.err (!%p863_p7)
}
  0x1d   : > { %s867_s7 = scalar_lea.vmem %s1057_s22, 16384  ;;  %p875_p2 = scmp.lt.s32.totalorder %s1057_s22, %s1057_s22 }
  0x1e   : > { %p868_p9 = scmp.ne.s32.totalorder %s1057_s22, %s867_s7  ;;  %p876_p6 = scmp.lt.s32.totalorder %s867_s7, %s867_s7 }
  0x20   : > { %p870_p10 = pnand %p868_p9, %p856_p13  ;;  %p877_p4 = por %p876_p6, %p875_p2 }
  0x22   : > { %p871_p1 = pneg %p870_p10 }
  0x24   : > { %p878_p8 = pnand %p877_p4, %p871_p1 }
  0x26   : > { %881 = shalt.err (!%p878_p8)
}
  0x27   : > { %s985_s8 = smov 256   ;;  %s986_s9 = smov 16  }
  0x28   : > { %798 = dma.hbm_to_vmem [thread:$0]  (!%p1064_p11), %s1229_s1, 16384, %s1057_s22, [#allocation6], %s985_s8, %s985_s8, %s986_s9  }
  0x29   : > { %p25_p2 = scmp.eq.s32.totalorder %s24_s26, 0  ;;  %p34_p1 = scmp.ne.s32.totalorder %s978_s14, %s974_s13 }
  0x2a   : > { %p35_p4 = scmp.eq.s32.totalorder %s982_s15, 0  ;;  %p808_p6 = scmp.lt.s32.totalorder %s982_s15, 2 }
  0x2b   : > { %s1100_s17 = scalar_select %p25_p2, %s978_s14, %s27_s25  }
  0x2c   : > { %p36_p8 = por %p35_p4, %p34_p1  ;;  %p1239_p10 = scmp.eq.s32.totalorder %s1034_s16, 1 }
  0x2d   : > { %s148_s27 = sand.u32 1, %s978_s14   ;;  %s648_s28 = sshll.u32 %s982_s15, 10 }
  0x2e   : > { %p1104_p12 = por %p1239_p10, %p34_p1  ;;  %s633_s29 = sshll.u32 %s148_s27, 6 }
  0x2f   : > { %s1113_s4 = scalar_lea.hbm %s1228_s0, %s648_s28  ;;  %s152_s22 = scalar_lea.vmem [#allocation2], %s633_s29 }
  0x30   : > { %s160_s25 = sshll.u32 %s152_s22, 4  ;;  %p1115_p11 = pnand %p808_p6, %p36_p8  ;;  %s1119_s25 = int_to_ptr.vmem [resolvable:$true] %s160_s25 }
  0x31   : > { %s1121_s5 = scalar_lea.sflag [#allocation3], %s148_s27  ;;  %s882_s6 = scalar_lea.hbm %s1113_s4, 1024 }
  0x32   : > { %p883_p13 = scmp.ne.s32.totalorder %s1113_s4, %s882_s6  ;;  %p884_p0 = pneg %p1115_p11 }
  0x33   : > { %s887_s9 = scalar_lea.hbm %s1228_s0, 2048  ;;  %p888_p7 = scmp.lt.u32.totalorder %s1113_s4, %s1228_s0 }
  0x34   : > { %p885_p3 = pnand %p884_p0, %p883_p13  ;;  %p889_p9 = scmp.lt.u32.totalorder %s887_s9, %s882_s6 }
  0x35   : > { %p891_p1 = scmp.lt.u32.totalorder %s882_s6, %s1113_s4 }
  0x36   : > { %p886_p5 = pneg %p885_p3  ;;  %p890_p2 = por %p889_p9, %p888_p7 }
  0x38   : > { %p892_p4 = por %p891_p1, %p890_p2 }
  0x3a   : > { %p893_p6 = pnand %p892_p4, %p886_p5 }
  0x3c   : > { %896 = shalt.err (!%p893_p6)
}
  0x3d   : > { %s897_s27 = scalar_lea.vmem %s1119_s25, 1024  ;;  %s987_s28 = smov [#allocation2]  }
  0x3e   : > { %p898_p8 = scmp.ne.s32.totalorder %s1119_s25, %s897_s27  ;;  %s902_s29 = sshll.u32 %s987_s28, 4  ;;  %s903_s29 = int_to_ptr.vmem [resolvable:$false] %s902_s29 }
  0x3f   : > { %s904_s23 = scalar_lea.vmem %s903_s29, 2048  ;;  %p905_p3 = scmp.lt.s32.totalorder %s1119_s25, %s903_s29 }
  0x40   : > { %p900_p10 = pnand %p898_p8, %p884_p0  ;;  %p906_p7 = scmp.lt.s32.totalorder %s904_s23, %s897_s27 }
  0x42   : > { %p901_p13 = pneg %p900_p10  ;;  %p907_p9 = por %p906_p7, %p905_p3 }
  0x44   : > { %p908_p2 = pnand %p907_p9, %p901_p13 }
  0x46   : > { %911 = shalt.err (!%p908_p2)
}
  0x47   : > { %s988_s30 = smov 512   ;;  %s989_s22 = smov 32  }
  0x48   : > { %802 = dma.hbm_to_vmem [thread:$0]  (!%p1115_p11), %s1113_s4, 1024, %s1119_s25, %s1121_s5, %s988_s30, %s988_s30, %s989_s22  }
  0x49   : > { %p1242_p0 = scmp.ne.s32.totalorder %s1237_s20, 0 }
  0x4a   : > { %s1152_s6 = sand.u32 (!%p1242_p0), 1, %s974_s13   ;;  %p1243_p5 = scmp.ne.s32.totalorder (!%p1242_p0), %s1235_s18, 0 }
  0x4b   : > { %172 = sbr.rel (%p1242_p0) target bundleno = 548 (0x224), region = 32  ;;  %s638_s7 = sshll.u32 (!%p1242_p0), %s1152_s6, 6 }
  0x4c   : > { %s175_s8 = scalar_lea.sflag (!%p1242_p0), [#allocation3], %s1152_s6  ;;  %s1156_s9 = scalar_lea.vmem (!%p1242_p0), [#allocation2], %s638_s7 }
  0x52   : > { %957 = dma.done.wait (%p1243_p5), %s175_s8, 1024  }
  0x53   : > { %959 = vsyncadd (%p1243_p5), %s175_s8, 4294966272  ;;  %p1244_p11 = scmp.eq.s32.totalorder %s1034_s16, 0 }
  0x55   : > { %961 = dma.done.wait (%p1244_p11), [#allocation6], 16384   ;;  %p1245_p1 = pmov %p1244_p11 }
  0x56   : > { %v216_v0 = vld [vmem:[#allocation5 + $0x8] sm:$0xff]  ;;  %v218_v1 = vld [vmem:[#allocation5 + $0x18] sm:$0xff]  ;;  %v215_v2 = vld [vmem:[#allocation5] sm:$0xff]  ;;  %s640_s4 = sshll.u32 %s1152_s6, 5  ;;  %s650_s25 = sshll.u32 %s1034_s16, 9 }
  0x57   : > { %963 = vsyncadd (%p1245_p1), [#allocation6], 4294950912  ;;  %v651_v3 = vpack.c.bf16 %v218_v1, %v216_v0  ;;  %v217_v4 = vld [vmem:[#allocation5 + $0x10] sm:$0xff]  ;;  %v280_v5 = vld [vmem:[#allocation5 + $0x208] sm:$0xff]  ;;  %s204_s26 = scalar_lea.vmem [#allocation7], %s640_s4  ;;  %s1182_s27 = scalar_lea.hbm %s1231_s3, %s650_s25 }
  0x58   : > { %v282_v6 = vld [vmem:[#allocation5 + $0x218] sm:$0xff]  ;;  %v653_v7 = vpack.c.bf16 %v217_v4, %v215_v2  ;;  %v279_v9 = vld [vmem:[#allocation5 + $0x200] sm:$0xff]  ;;  %v281_v10 = vld [vmem:[#allocation5 + $0x210] sm:$0xff]  ;;  %s546_s5 = sshll.u32 %s204_s26, 4  ;;  %s532_s16 = scalar_lea.sflag [#allocation4], %s1152_s6  ;;  %s1184_s5 = int_to_ptr.vmem [resolvable:$true] %s546_s5 }
  0x59   : > { %v715_v8 = vpack.c.bf16 %v282_v6, %v280_v5  ;;  %v220_v11 = vld [vmem:[#allocation5 + $0x28] sm:$0xff]  ;;  %652 = vmatprep.subr.bf16.mxu1 %v651_v3  ;;  %v717_v12 = vpack.c.bf16 %v281_v10, %v279_v9  ;;  %v222_v13 = vld [vmem:[#allocation5 + $0x38] sm:$0xff]  ;;  %v219_v14 = vld [vmem:[#allocation5 + $0x20] sm:$0xff]  ;;  %s912_s28 = scalar_lea.vmem %s1184_s5, 512  ;;  %s990_s29 = smov [#allocation7]  }
  0x5a   : > { %v221_v15 = vld [vmem:[#allocation5 + $0x30] sm:$0xff]  ;;  %654 = vmatpush1.bf16.msra.mxu1 %v653_v7  ;;  %v655_v16 = vpack.c.bf16 %v222_v13, %v220_v11  ;;  %v284_v18 = vld [vmem:[#allocation5 + $0x228] sm:$0xff]  ;;  %v286_v19 = vld [vmem:[#allocation5 + $0x238] sm:$0xff]  ;;  %p913_p4 = scmp.ne.s32.totalorder %s1184_s5, %s912_s28  ;;  %s916_s23 = sshll.u32 %s990_s29, 4  ;;  %s917_s23 = int_to_ptr.vmem [resolvable:$false] %s916_s23 }
  0x5b   : > { %716 = vmatprep.subr.bf16.mxu0 %v715_v8  ;;  %v657_v17 = vpack.c.bf16 %v221_v15, %v219_v14  ;;  %v283_v20 = vld [vmem:[#allocation5 + $0x220] sm:$0xff]  ;;  %v719_v21 = vpack.c.bf16 %v286_v19, %v284_v18  ;;  %v285_v22 = vld [vmem:[#allocation5 + $0x230] sm:$0xff]  ;;  %v224_v23 = vld [vmem:[#allocation5 + $0x48] sm:$0xff]  ;;  %s918_s30 = scalar_lea.vmem %s917_s23, 1024  ;;  %p919_p10 = scmp.lt.s32.totalorder %s1184_s5, %s917_s23 }
  0x5c   : > { %718 = vmatpush1.bf16.msra.mxu0 %v717_v12  ;;  %v226_v24 = vld [vmem:[#allocation5 + $0x58] sm:$0xff]  ;;  %656 = vmatprep.subr.bf16.mxu1 %v655_v16  ;;  %v721_v25 = vpack.c.bf16 %v285_v22, %v283_v20  ;;  %v223_v27 = vld [vmem:[#allocation5 + $0x40] sm:$0xff]  ;;  %v225_v28 = vld [vmem:[#allocation5 + $0x50] sm:$0xff]  ;;  %p914_p6 = pnand %p913_p4, %p1104_p12  ;;  %p920_p13 = scmp.lt.s32.totalorder %s918_s30, %s912_s28 }
  0x5d   : > { %v659_v26 = vpack.c.bf16 %v226_v24, %v224_v23  ;;  %v288_v29 = vld [vmem:[#allocation5 + $0x248] sm:$0xff]  ;;  %720 = vmatprep.subr.bf16.mxu0 %v719_v21  ;;  %v290_v30 = vld [vmem:[#allocation5 + $0x258] sm:$0xff]  ;;  %v287_v31 = vld [vmem:[#allocation5 + $0x240] sm:$0xff]  ;;  %v661_v33 = vpack.c.bf16 %v225_v28, %v223_v27 }
  0x5e   : > { %v289_v32 = vld [vmem:[#allocation5 + $0x250] sm:$0xff]  ;;  %658 = vmatpush1.bf16.msra.mxu1 %v657_v17  ;;  %v723_v34 = vpack.c.bf16 %v290_v30, %v288_v29  ;;  %v228_v35 = vld [vmem:[#allocation5 + $0x68] sm:$0xff]  ;;  %v230_v36 = vld [vmem:[#allocation5 + $0x78] sm:$0xff]  ;;  %p915_p8 = pneg %p914_p6  ;;  %p921_p3 = por %p920_p13, %p919_p10 }
  0x5f   : > { %v227_v37 = vld [vmem:[#allocation5 + $0x60] sm:$0xff]  ;;  %660 = vmatprep.subr.bf16.mxu1 %v659_v26  ;;  %v725_v38 = vpack.c.bf16 %v289_v32, %v287_v31  ;;  %v663_v39 = vpack.c.bf16 %v230_v36, %v228_v35  ;;  %v229_v40 = vld [vmem:[#allocation5 + $0x70] sm:$0xff]  ;;  %v292_v41 = vld [vmem:[#allocation5 + $0x268] sm:$0xff] }
  0x60   : > { %722 = vmatpush1.bf16.msra.mxu0 %v721_v25  ;;  %v294_v42 = vld [vmem:[#allocation5 + $0x278] sm:$0xff]  ;;  %v291_v44 = vld [vmem:[#allocation5 + $0x260] sm:$0xff]  ;;  %v293_v45 = vld [vmem:[#allocation5 + $0x270] sm:$0xff]  ;;  %v665_v48 = vpack.c.bf16 %v229_v40, %v227_v37  ;;  %p922_p7 = pnand %p921_p3, %p915_p8 }
  0x61   : > { %724 = vmatprep.subr.bf16.mxu0 %v723_v34  ;;  %v727_v43 = vpack.c.bf16 %v294_v42, %v292_v41  ;;  %v232_v46 = vld [vmem:[#allocation5 + $0x88] sm:$0xff]  ;;  %v234_v47 = vld [vmem:[#allocation5 + $0x98] sm:$0xff]  ;;  %v729_v51 = vpack.c.bf16 %v293_v45, %v291_v44  ;;  %v231_v53 = vld [vmem:[#allocation5 + $0x80] sm:$0xff] }
  0x62   : > { %662 = vmatpush1.bf16.msra.mxu1 %v661_v33  ;;  %v296_v49 = vld [vmem:[#allocation5 + $0x288] sm:$0xff]  ;;  %v298_v50 = vld [vmem:[#allocation5 + $0x298] sm:$0xff]  ;;  %v667_v52 = vpack.c.bf16 %v234_v47, %v232_v46  ;;  %v233_v54 = vld [vmem:[#allocation5 + $0x90] sm:$0xff] }
  0x63   : > { %664 = vmatprep.subr.bf16.mxu1 %v663_v39  ;;  %v295_v55 = vld [vmem:[#allocation5 + $0x280] sm:$0xff]  ;;  %v731_v56 = vpack.c.bf16 %v298_v50, %v296_v49  ;;  %v297_v57 = vld [vmem:[#allocation5 + $0x290] sm:$0xff]  ;;  %v236_v58 = vld [vmem:[#allocation5 + $0xa8] sm:$0xff]  ;;  %v669_v62 = vpack.c.bf16 %v233_v54, %v231_v53 }
  0x64   : > { %726 = vmatpush1.bf16.msra.mxu0 %v725_v38  ;;  %v238_v59 = vld [vmem:[#allocation5 + $0xb8] sm:$0xff]  ;;  %v300_v60 = vld [vmem:[#allocation5 + $0x2a8] sm:$0xff]  ;;  %v733_v63 = vpack.c.bf16 %v297_v57, %v295_v55  ;;  %v235_v1 = vld [vmem:[#allocation5 + $0xa0] sm:$0xff] }
  0x65   : > { %728 = vmatprep.subr.bf16.mxu0 %v727_v43  ;;  %v302_v61 = vld [vmem:[#allocation5 + $0x2b8] sm:$0xff]  ;;  %v671_v0 = vpack.c.bf16 %v238_v59, %v236_v58  ;;  %v237_v2 = vld [vmem:[#allocation5 + $0xb0] sm:$0xff]  ;;  %v299_v3 = vld [vmem:[#allocation5 + $0x2a0] sm:$0xff] }
  0x66   : > { %666 = vmatpush1.bf16.msra.mxu1 %v665_v48  ;;  %v735_v4 = vpack.c.bf16 %v302_v61, %v300_v60  ;;  %v301_v5 = vld [vmem:[#allocation5 + $0x2b0] sm:$0xff]  ;;  %v240_v6 = vld [vmem:[#allocation5 + $0xc8] sm:$0xff]  ;;  %v242_v7 = vld [vmem:[#allocation5 + $0xd8] sm:$0xff]  ;;  %v673_v10 = vpack.c.bf16 %v237_v2, %v235_v1 }
  0x67   : > { %668 = vmatprep.subr.bf16.mxu1 %v667_v52  ;;  %v304_v8 = vld [vmem:[#allocation5 + $0x2c8] sm:$0xff]  ;;  %v306_v9 = vld [vmem:[#allocation5 + $0x2d8] sm:$0xff]  ;;  %v737_v11 = vpack.c.bf16 %v301_v5, %v299_v3  ;;  %v675_v12 = vpack.c.bf16 %v242_v7, %v240_v6  ;;  %v239_v13 = vld [vmem:[#allocation5 + $0xc0] sm:$0xff] }
  0x68   : > { %730 = vmatpush1.bf16.msra.mxu0 %v729_v51  ;;  %v241_v14 = vld [vmem:[#allocation5 + $0xd0] sm:$0xff]  ;;  %v303_v15 = vld [vmem:[#allocation5 + $0x2c0] sm:$0xff]  ;;  %v739_v16 = vpack.c.bf16 %v306_v9, %v304_v8  ;;  %v244_v18 = vld [vmem:[#allocation5 + $0xe8] sm:$0xff] }
  0x69   : > { %732 = vmatprep.subr.bf16.mxu0 %v731_v56  ;;  %v305_v17 = vld [vmem:[#allocation5 + $0x2d0] sm:$0xff]  ;;  %v246_v19 = vld [vmem:[#allocation5 + $0xf8] sm:$0xff]  ;;  %v308_v20 = vld [vmem:[#allocation5 + $0x2e8] sm:$0xff]  ;;  %v677_v22 = vpack.c.bf16 %v241_v14, %v239_v13 }
  0x6a   : > { %670 = vmatpush1.bf16.msra.mxu1 %v669_v62  ;;  %v310_v21 = vld [vmem:[#allocation5 + $0x2f8] sm:$0xff]  ;;  %v741_v23 = vpack.c.bf16 %v305_v17, %v303_v15  ;;  %v679_v24 = vpack.c.bf16 %v246_v19, %v244_v18  ;;  %v243_v25 = vld [vmem:[#allocation5 + $0xe0] sm:$0xff]  ;;  %v245_v26 = vld [vmem:[#allocation5 + $0xf0] sm:$0xff] }
  0x6b   : > { %672 = vmatprep.subr.bf16.mxu1 %v671_v0  ;;  %v307_v27 = vld [vmem:[#allocation5 + $0x2e0] sm:$0xff]  ;;  %v743_v28 = vpack.c.bf16 %v310_v21, %v308_v20  ;;  %v309_v29 = vld [vmem:[#allocation5 + $0x2f0] sm:$0xff]  ;;  %v248_v30 = vld [vmem:[#allocation5 + $0x108] sm:$0xff]  ;;  %v681_v34 = vpack.c.bf16 %v245_v26, %v243_v25 }
  0x6c   : > { %734 = vmatpush1.bf16.msra.mxu0 %v733_v63  ;;  %v250_v31 = vld [vmem:[#allocation5 + $0x118] sm:$0xff]  ;;  %v312_v32 = vld [vmem:[#allocation5 + $0x308] sm:$0xff]  ;;  %v745_v35 = vpack.c.bf16 %v309_v29, %v307_v27  ;;  %v247_v37 = vld [vmem:[#allocation5 + $0x100] sm:$0xff] }
  0x6d   : > { %736 = vmatprep.subr.bf16.mxu0 %v735_v4  ;;  %v314_v33 = vld [vmem:[#allocation5 + $0x318] sm:$0xff]  ;;  %v683_v36 = vpack.c.bf16 %v250_v31, %v248_v30  ;;  %v249_v38 = vld [vmem:[#allocation5 + $0x110] sm:$0xff]  ;;  %v311_v39 = vld [vmem:[#allocation5 + $0x300] sm:$0xff] }
  0x6e   : > { %674 = vmatpush1.bf16.msra.mxu1 %v673_v10  ;;  %v747_v40 = vpack.c.bf16 %v314_v33, %v312_v32  ;;  %v313_v41 = vld [vmem:[#allocation5 + $0x310] sm:$0xff]  ;;  %v252_v42 = vld [vmem:[#allocation5 + $0x128] sm:$0xff]  ;;  %v254_v43 = vld [vmem:[#allocation5 + $0x138] sm:$0xff]  ;;  %v685_v46 = vpack.c.bf16 %v249_v38, %v247_v37 }
  0x6f   : > { %676 = vmatprep.subr.bf16.mxu1 %v675_v12  ;;  %v316_v44 = vld [vmem:[#allocation5 + $0x328] sm:$0xff]  ;;  %v318_v45 = vld [vmem:[#allocation5 + $0x338] sm:$0xff]  ;;  %v749_v47 = vpack.c.bf16 %v313_v41, %v311_v39  ;;  %v687_v48 = vpack.c.bf16 %v254_v43, %v252_v42  ;;  %v251_v49 = vld [vmem:[#allocation5 + $0x120] sm:$0xff] }
  0x70   : > { %738 = vmatpush1.bf16.msra.mxu0 %v737_v11  ;;  %v253_v50 = vld [vmem:[#allocation5 + $0x130] sm:$0xff]  ;;  %v315_v51 = vld [vmem:[#allocation5 + $0x320] sm:$0xff]  ;;  %v751_v52 = vpack.c.bf16 %v318_v45, %v316_v44  ;;  %v256_v54 = vld [vmem:[#allocation5 + $0x148] sm:$0xff] }
  0x71   : > { %740 = vmatprep.subr.bf16.mxu0 %v739_v16  ;;  %v317_v53 = vld [vmem:[#allocation5 + $0x330] sm:$0xff]  ;;  %v258_v55 = vld [vmem:[#allocation5 + $0x158] sm:$0xff]  ;;  %v320_v56 = vld [vmem:[#allocation5 + $0x348] sm:$0xff]  ;;  %v689_v58 = vpack.c.bf16 %v253_v50, %v251_v49 }
  0x72   : > { %678 = vmatpush1.bf16.msra.mxu1 %v677_v22  ;;  %v322_v57 = vld [vmem:[#allocation5 + $0x358] sm:$0xff]  ;;  %v753_v59 = vpack.c.bf16 %v317_v53, %v315_v51  ;;  %v691_v60 = vpack.c.bf16 %v258_v55, %v256_v54  ;;  %v255_v61 = vld [vmem:[#allocation5 + $0x140] sm:$0xff]  ;;  %v257_v62 = vld [vmem:[#allocation5 + $0x150] sm:$0xff] }
  0x73   : > { %680 = vmatprep.subr.bf16.mxu1 %v679_v24  ;;  %v319_v63 = vld [vmem:[#allocation5 + $0x340] sm:$0xff]  ;;  %v755_v0 = vpack.c.bf16 %v322_v57, %v320_v56  ;;  %v321_v1 = vld [vmem:[#allocation5 + $0x350] sm:$0xff]  ;;  %v260_v2 = vld [vmem:[#allocation5 + $0x168] sm:$0xff]  ;;  %v693_v6 = vpack.c.bf16 %v257_v62, %v255_v61 }
  0x74   : > { %742 = vmatpush1.bf16.msra.mxu0 %v741_v23  ;;  %v262_v3 = vld [vmem:[#allocation5 + $0x178] sm:$0xff]  ;;  %v324_v4 = vld [vmem:[#allocation5 + $0x368] sm:$0xff]  ;;  %v259_v7 = vld [vmem:[#allocation5 + $0x160] sm:$0xff]  ;;  %v757_v8 = vpack.c.bf16 %v321_v1, %v319_v63 }
  0x75   : > { %744 = vmatprep.subr.bf16.mxu0 %v743_v28  ;;  %v326_v5 = vld [vmem:[#allocation5 + $0x378] sm:$0xff]  ;;  %v695_v9 = vpack.c.bf16 %v262_v3, %v260_v2  ;;  %v261_v10 = vld [vmem:[#allocation5 + $0x170] sm:$0xff]  ;;  %v323_v11 = vld [vmem:[#allocation5 + $0x360] sm:$0xff] }
  0x76   : > { %682 = vmatpush1.bf16.msra.mxu1 %v681_v34  ;;  %v325_v12 = vld [vmem:[#allocation5 + $0x370] sm:$0xff]  ;;  %v759_v13 = vpack.c.bf16 %v326_v5, %v324_v4  ;;  %v264_v14 = vld [vmem:[#allocation5 + $0x188] sm:$0xff]  ;;  %v266_v15 = vld [vmem:[#allocation5 + $0x198] sm:$0xff]  ;;  %v697_v20 = vpack.c.bf16 %v261_v10, %v259_v7 }
  0x77   : > { %684 = vmatprep.subr.bf16.mxu1 %v683_v36  ;;  %v208_v16 = vld [vmem:[%s1156_s9 + $0x8] sm:$0xff]  ;;  %v330_v18 = vld [vmem:[#allocation5 + $0x398] sm:$0xff]  ;;  %v761_v21 = vpack.c.bf16 %v325_v12, %v323_v11  ;;  %v699_v22 = vpack.c.bf16 %v266_v15, %v264_v14  ;;  %v263_v23 = vld [vmem:[#allocation5 + $0x180] sm:$0xff] }
  0x78   : > { %746 = vmatpush1.bf16.msra.mxu0 %v745_v35  ;;  %v328_v17 = vld [vmem:[#allocation5 + $0x388] sm:$0xff]  ;;  %419 = vmatprep.mubr.f32.mxu1 %v208_v16  ;;  %v210_v19 = vld [vmem:[%s1156_s9 + $0x18] sm:$0xff]  ;;  %v265_v24 = vld [vmem:[#allocation5 + $0x190] sm:$0xff] }
  0x79   : > { %748 = vmatprep.subr.bf16.mxu0 %v747_v40  ;;  %496 = vmatprep.mubr.f32.mxu0 %v210_v19  ;;  %v327_v25 = vld [vmem:[#allocation5 + $0x380] sm:$0xff]  ;;  %v763_v26 = vpack.c.bf16 %v330_v18, %v328_v17  ;;  %v329_v27 = vld [vmem:[#allocation5 + $0x390] sm:$0xff]  ;;  %v268_v28 = vld [vmem:[#allocation5 + $0x1a8] sm:$0xff]  ;;  %v701_v32 = vpack.c.bf16 %v265_v24, %v263_v23 }
  0x7a   : > { %686 = vmatpush1.bf16.msra.mxu1 %v685_v46  ;;  %v270_v29 = vld [vmem:[#allocation5 + $0x1b8] sm:$0xff]  ;;  %v332_v30 = vld [vmem:[#allocation5 + $0x3a8] sm:$0xff]  ;;  %v765_v33 = vpack.c.bf16 %v329_v27, %v327_v25  ;;  %v267_v35 = vld [vmem:[#allocation5 + $0x1a0] sm:$0xff] }
  0x7b   : > { %688 = vmatprep.subr.bf16.mxu1 %v687_v48  ;;  %v334_v31 = vld [vmem:[#allocation5 + $0x3b8] sm:$0xff]  ;;  %v703_v34 = vpack.c.bf16 %v270_v29, %v268_v28  ;;  %v269_v36 = vld [vmem:[#allocation5 + $0x1b0] sm:$0xff]  ;;  %v331_v37 = vld [vmem:[#allocation5 + $0x3a0] sm:$0xff] }
  0x7c   : > { %750 = vmatpush1.bf16.msra.mxu0 %v749_v47  ;;  %v767_v38 = vpack.c.bf16 %v334_v31, %v332_v30  ;;  %v333_v39 = vld [vmem:[#allocation5 + $0x3b0] sm:$0xff]  ;;  %v272_v40 = vld [vmem:[#allocation5 + $0x1c8] sm:$0xff]  ;;  %v274_v41 = vld [vmem:[#allocation5 + $0x1d8] sm:$0xff]  ;;  %v705_v44 = vpack.c.bf16 %v269_v36, %v267_v35 }
  0x7d   : > { %752 = vmatprep.subr.bf16.mxu0 %v751_v52  ;;  %v336_v42 = vld [vmem:[#allocation5 + $0x3c8] sm:$0xff]  ;;  %v338_v43 = vld [vmem:[#allocation5 + $0x3d8] sm:$0xff]  ;;  %v769_v45 = vpack.c.bf16 %v333_v39, %v331_v37  ;;  %v707_v46 = vpack.c.bf16 %v274_v41, %v272_v40  ;;  %v271_v47 = vld [vmem:[#allocation5 + $0x1c0] sm:$0xff] }
  0x7e   : > { %690 = vmatpush1.bf16.msra.mxu1 %v689_v58  ;;  %v273_v48 = vld [vmem:[#allocation5 + $0x1d0] sm:$0xff]  ;;  %v335_v49 = vld [vmem:[#allocation5 + $0x3c0] sm:$0xff]  ;;  %v771_v50 = vpack.c.bf16 %v338_v43, %v336_v42  ;;  %v276_v52 = vld [vmem:[#allocation5 + $0x1e8] sm:$0xff] }
  0x7f   : > { %692 = vmatprep.subr.bf16.mxu1 %v691_v60  ;;  %v337_v51 = vld [vmem:[#allocation5 + $0x3d0] sm:$0xff]  ;;  %v278_v53 = vld [vmem:[#allocation5 + $0x1f8] sm:$0xff]  ;;  %v340_v54 = vld [vmem:[#allocation5 + $0x3e8] sm:$0xff]  ;;  %v709_v56 = vpack.c.bf16 %v273_v48, %v271_v47 }
  0x80   : > { %754 = vmatpush1.bf16.msra.mxu0 %v753_v59  ;;  %v342_v55 = vld [vmem:[#allocation5 + $0x3f8] sm:$0xff]  ;;  %v773_v57 = vpack.c.bf16 %v337_v51, %v335_v49  ;;  %v711_v58 = vpack.c.bf16 %v278_v53, %v276_v52  ;;  %v275_v59 = vld [vmem:[#allocation5 + $0x1e0] sm:$0xff]  ;;  %v277_v60 = vld [vmem:[#allocation5 + $0x1f0] sm:$0xff] }
  0x81   : > { %756 = vmatprep.subr.bf16.mxu0 %v755_v0  ;;  %v775_v61 = vpack.c.bf16 %v342_v55, %v340_v54  ;;  %v339_v62 = vld [vmem:[#allocation5 + $0x3e0] sm:$0xff]  ;;  %v341_v63 = vld [vmem:[#allocation5 + $0x3f0] sm:$0xff]  ;;  %v713_v0 = vpack.c.bf16 %v277_v60, %v275_v59  ;;  %v212_v4 = vld [vmem:[%s1156_s9 + $0x28] sm:$0xff] }
  0x82   : > { %694 = vmatpush1.bf16.msra.mxu1 %v693_v6  ;;  %v777_v1 = vpack.c.bf16 %v341_v63, %v339_v62  ;;  %v207_v2 = vld [vmem:[%s1156_s9] sm:$0xff]  ;;  %v209_v3 = vld [vmem:[%s1156_s9 + $0x10] sm:$0xff]  ;;  %v214_v5 = vld [vmem:[%s1156_s9 + $0x38] sm:$0xff] }
  0x83   : > { %696 = vmatprep.subr.bf16.mxu1 %v695_v9  ;;  %v211_v6 = vld [vmem:[%s1156_s9 + $0x20] sm:$0xff]  ;;  %v213_v7 = vld [vmem:[%s1156_s9 + $0x30] sm:$0xff] }
  0x84   : > { %758 = vmatpush1.bf16.msra.mxu0 %v757_v8  ;;  %v345_v8 = vlaneseq  ;;  %v343_v11 = vld [vmem:[%s1230_s2] sm:$0x3] }
  0x85   : > { %760 = vmatprep.subr.bf16.mxu0 %v759_v13 }
  0x86   : > { %698 = vmatpush1.bf16.msra.mxu1 %v697_v20  ;;  %v346_v9 = vshrl.u32 %v345_v8, 7 }
  0x87   : > { %700 = vmatprep.subr.bf16.mxu1 %v699_v22 }
  0x88   : > { %762 = vmatpush1.bf16.msra.mxu0 %v761_v21  ;;  %v347_v10 = vsub.s32 0, %v346_v9  ;;  %v351_v12 = vsub.s32 1, %v346_v9 }
  0x89   : > { %764 = vmatprep.subr.bf16.mxu0 %v763_v26 }
  0x8a   : > { %702 = vmatpush1.bf16.msra.mxu1 %v701_v32  ;;  %v348_v13 = vrot.slane %v343_v11, %v347_v10  ;;  %v352_v14 = vrot.slane %v343_v11, %v351_v12 }
  0x8b   : > { %704 = vmatprep.subr.bf16.mxu1 %v703_v34 }
  0x8c   : > { %766 = vmatpush1.bf16.msra.mxu0 %v765_v33 }
  0x8d   : > { %768 = vmatprep.subr.bf16.mxu0 %v767_v38 }
  0x8e   : > { %706 = vmatpush1.bf16.msra.mxu1 %v705_v44 }
  0x8f   : > { %708 = vmatprep.subr.bf16.mxu1 %v707_v46 }
  0x90   : > { %770 = vmatpush1.bf16.msra.mxu0 %v769_v45 }
  0x91   : > { %772 = vmatprep.subr.bf16.mxu0 %v771_v50 }
  0x92   : > { %710 = vmatpush1.bf16.msra.mxu1 %v709_v56 }
  0x93   : > { %712 = vmatprep.subr.bf16.mxu1 %v711_v58 }
  0x94   : > { %774 = vmatpush1.bf16.msra.mxu0 %v773_v57 }
  0x95   : > { %776 = vmatprep.subr.bf16.mxu0 %v775_v61 }
  0x96   : > { %714 = vmatpush1.bf16.msra.mxu1 %v713_v0 }
  0x98   : > { %778 = vmatpush1.bf16.msra.mxu0 %v777_v1 }
  0x99   : > { %420 = vmatmul.mubr.f32.vlgmr.msra.gmra.mrb[0].mxu1 %v207_v2 }
  0x9a   : > { %425 = vmatprep.mubr.f32.mxu1 %v212_v4 }
  0x9b   : > { %497 = vmatmul.mubr.f32.vlgmr.msra.gmra.mrb[0].mxu0 %v209_v3 }
  0x9c   : > { %502 = vmatprep.mubr.f32.mxu0 %v214_v5 }
  0x9d   : > { %426 = vmatmul.mubr.f32.gmra.mrb[2].mxu1 %v211_v6 }
  0x9f   : > { %503 = vmatmul.mubr.f32.gmra.mrb[2].mxu0 %v213_v7 }
 0x16c   : > { %v421_v15 = vpop.f32.mrb[0].mxu1 }
 0x16d   : > { %v422_v16 = vadd.f32 %v421_v15, %v348_v13  ;;  %v423_v17 = vpop.f32.mrb[1].mxu1 }
 0x16e   : > { %v498_v18 = vpop.f32.mrb[0].mxu0  ;;  %v424_v19 = vadd.f32 %v423_v17, %v352_v14 }
 0x16f   : > { %v500_v20 = vpop.f32.mrb[1].mxu0  ;;  %v499_v21 = vadd.f32 %v498_v18, %v422_v16 }
 0x170   : > { %v501_v22 = vadd.f32 %v500_v20, %v424_v19  ;;  %v427_v23 = vpop.f32.mrb[2].mxu1 }
 0x171   : > { %v428_v24 = vadd.f32 %v427_v23, %v348_v13  ;;  %v429_v25 = vpop.f32.mrb[3].mxu1  ;;  %v509_v27 = vmul.f32 %v499_v21, %v499_v21 }
 0x172   : > { %v504_v26 = vpop.f32.mrb[2].mxu0  ;;  %v430_v28 = vadd.f32 %v429_v25, %v352_v14  ;;  %v510_v30 = vmul.f32 %v501_v22, %v501_v22 }
 0x173   : > { %v506_v29 = vpop.f32.mrb[3].mxu0  ;;  %v505_v31 = vadd.f32 %v504_v26, %v428_v24 }
 0x174   : > { %v507_v32 = vadd.f32 %v506_v29, %v430_v28  ;;  %v513_v33 = vadd.f32 %v510_v30, %v509_v27 }
 0x175   : > { %v511_v34 = vmul.f32 %v505_v31, %v505_v31 }
 0x176   : > { %v512_v35 = vmul.f32 %v507_v32, %v507_v32  ;;  %514 = vadd.xlane.f32.xlu0 %v513_v33 }
 0x178   : > { %v516_v36 = vadd.f32 %v512_v35, %v511_v34 }
 0x17a   : > { %517 = vadd.xlane.f32.xlu0 %v516_v36 }
 0x203   : > { %v515_v37 = vpop.xlane.xlu0 %514 }
 0x204   : > { %850 = vrsqrt.f32 %v515_v37 }
 0x207   : > { %v518_v38 = vpop.xlane.xlu0 %517 }
 0x208   : > { %852 = vrsqrt.f32 %v518_v38 }
 0x20e   : > { %v851_v39 = vpop.eup %850 }
 0x20f   : > { %v523_v40 = vmul.f32 %v851_v39, %v499_v21  ;;  %v524_v41 = vmul.f32 %v851_v39, %v501_v22 }
 0x211   : > { %527 = vst [vmem:[%s204_s26] sm:$0xff] %v523_v40  ;;  %528 = vst [vmem:[%s204_s26 + $0x8] sm:$0xff] %v524_v41 }
 0x212   : > { %v853_v42 = vpop.eup %852 }
 0x213   : > { %v525_v43 = vmul.f32 %v853_v42, %v505_v31  ;;  %v526_v44 = vmul.f32 %v853_v42, %v507_v32 }
 0x215   : > { %529 = vst [vmem:[%s204_s26 + $0x10] sm:$0xff] %v525_v43  ;;  %530 = vst [vmem:[%s204_s26 + $0x18] sm:$0xff] %v526_v44 }
 0x216   : > { %925 = shalt.err (!%p922_p7)
}
 0x217   : > { %s926_s22 = scalar_lea.hbm %s1182_s27, 512  ;;  %s930_s9 = scalar_lea.hbm %s1231_s3, 1024 }
 0x218   : > { %p927_p9 = scmp.ne.s32.totalorder %s1182_s27, %s926_s22  ;;  %p931_p5 = scmp.lt.u32.totalorder %s1182_s27, %s1231_s3 }
 0x219   : > { %p932_p11 = scmp.lt.u32.totalorder %s930_s9, %s926_s22  ;;  %p934_p4 = scmp.lt.u32.totalorder %s926_s22, %s1182_s27 }
 0x21a   : > { %p928_p2 = pnand %p927_p9, %p1104_p12 }
 0x21b   : > { %p933_p1 = por %p932_p11, %p931_p5 }
 0x21c   : > { %p929_p0 = pneg %p928_p2 }
 0x21d   : > { %p935_p6 = por %p934_p4, %p933_p1 }
 0x21f   : > { %p936_p8 = pnand %p935_p6, %p929_p0 }
 0x221   : > { %939 = shalt.err (!%p936_p8)
}
 0x222   : > { %s991_s4 = smov 256   ;;  %s992_s25 = smov 16  }
 0x223   : > { %793 = dma.vmem_to_hbm [thread:$0]  (%p1104_p12), %s1184_s5, 512, %s1182_s27, %s532_s16, %s991_s4, %s991_s4, %s992_s25  }
 0x224 PF: > { %s561_s26 = sand.u32 1, %s970_s12   ;;  %p1246_p10 = scmp.ne.s32.totalorder %s1236_s19, 0 }
 0x225   : > { %p1247_p13 = scmp.ge.s32.totalorder %s982_s15, 2  ;;  %s562_s10 = scalar_lea.sflag [#allocation4], %s561_s26 }
 0x227   : > { %p804_p3 = pnand %p1247_p13, %p1246_p10 }
 0x229   : > { %965 = dma.done.wait (!%p804_p3), %s562_s10, 512  }
 0x22a   : > { %967 = vsyncadd (!%p804_p3), %s562_s10, 4294966784  ;;  %p17_p7 = scmp.ge.s32.totalorder %s1069_s24, 4   ;;  %s1248_s12 = smov %s974_s13 }
 0x22b   : > { %s1249_s13 = smov %s978_s14  ;;  %s1250_s14 = smov %s1100_s17 }
 0x22c   : > { %s1251_s15 = smov %s1069_s24  ;;  %19 = sbr.rel (!%p17_p7) target bundleno = 6 (0x6), region = 81 }
 0x233   :  { %567 = vsyncpa [#allocation3], 1 }
 0x234   :  { %569 = vsyncpa [#allocation3 + $0x1], 1 }
 0x235   :  { %570 = vsyncpa [#allocation6], 1 }
 0x236   :  { %571 = vsyncpa [#allocation4], 1 }
 0x237   :  { %573 = vsyncpa [#allocation4 + $0x1], 1 }

</bundles_post_ra>
